<compile_context>
chip_gen: v7x
topology: tpu7x:2x2x1
jax: 0.10.0
libtpu: 0.0.40
codegen_flags: <defaults>
</compile_context>

<pallas_src>
import functools

import jax
import jax.numpy as jnp
from jax.experimental import pallas as pl
from jax.experimental.pallas import tpu as pltpu


def _round_up(v, m):
    return ((v + m - 1) // m) * m


def _pick_hw_tile(col_bytes, hw, max_block_bytes=8 * 1024 * 1024):
    """Largest multiple-of-128 lane tile whose (rows x lanes) block fits the budget."""
    hw_pad = _round_up(hw, 128)
    t = max(128, (max_block_bytes // max(col_bytes, 1)) // 128 * 128)
    return int(min(t, hw_pad))


def _pool_conv_bn_relu_kernel(x_ref, w_ref, shift_ref, y_ref, acc_ref, *, hw, hw_tile):
    """Pass 1: tiled global-avg-pool, then folded 1x1-conv + BN + ReLU on the last step.

    x_ref:     (N, C_in, hw_tile)   current HW tile of the input
    w_ref:     (C_in, C_out)        conv weight, pre-transposed, BN scale folded in
    shift_ref: (1, C_out)           folded BN shift = beta - mean * gamma/sqrt(var+eps)
    y_ref:     (N, C_out)           output (written only on the last grid step)
    acc_ref:   (N, C_in, 128) f32   resident partial-sum accumulator (VMEM scratch)
    """
    k = pl.program_id(0)

    @pl.when(k == 0)
    def _init():
        acc_ref[...] = jnp.zeros_like(acc_ref)

    # Accumulate 128-lane chunks with elementwise VPU adds (no per-tile XLU
    # lane reduction).  Mask lanes past the true HW so the padded tail of the
    # last tile (undefined values) does not bias the mean.
    base = k * hw_tile
    psum = jnp.zeros(acc_ref.shape, jnp.float32)
    for j in range(hw_tile // 128):
        lane = jax.lax.broadcasted_iota(jnp.int32, (1, 1, 128), 2) + (base + j * 128)
        chunk = x_ref[:, :, j * 128:(j + 1) * 128].astype(jnp.float32)
        psum = psum + jnp.where(lane < hw, chunk, 0.0)
    acc_ref[...] += psum

    @pl.when(k == pl.num_programs(0) - 1)
    def _finalize():
        # Single cross-lane reduce at the very end, then divide by the true HW.
        pooled = jnp.sum(acc_ref[...], axis=-1) * (1.0 / hw)          # (N, C_in)
        y = jnp.dot(pooled, w_ref[...], preferred_element_type=jnp.float32)
        y_ref[...] = jnp.maximum(y + shift_ref[...], 0.0)             # BN shift + ReLU


def _broadcast_kernel(y_ref, o_ref):
    """Pass 2: splat the (N, C_out) activated vector across a lane-dense HW tile."""
    y = y_ref[...].astype(o_ref.dtype)           # cast once at (N, C_out) size
    o_ref[...] = jnp.broadcast_to(y[:, :, None], o_ref.shape)


def aspp_pooling(x, conv_w, bn_gamma, bn_beta, bn_mean, bn_var, eps=1e-5, hw_tile=None):
    """x: (N, C_in, H, W) NCHW. conv_w: (C_out, C_in, 1, 1). Returns (N, C_out, H, W)."""
    n, c_in, h, w = x.shape
    c_out = conv_w.shape[0]
    hw = h * w

    x_flat = x.reshape(n, c_in, hw)

    # Fold eval-mode BatchNorm into the 1x1 conv weight (pre-transposed) + shift.
    w2d = conv_w.reshape(c_out, c_in).astype(jnp.float32)
    inv_std = jax.lax.rsqrt(bn_var.astype(jnp.float32) + eps)
    scale = bn_gamma.astype(jnp.float32) * inv_std                    # (C_out,)
    w_folded = (w2d * scale[:, None]).T                               # (C_in, C_out)
    shift = (bn_beta.astype(jnp.float32)
             - bn_mean.astype(jnp.float32) * scale).reshape(1, c_out)

    in_itemsize = x.dtype.itemsize
    out_itemsize = x.dtype.itemsize

    if hw_tile is None:
        t_red = _pick_hw_tile(n * c_in * in_itemsize, hw)
        t_bc = _pick_hw_tile(n * c_out * out_itemsize, hw)
    else:
        t_red = t_bc = _round_up(int(hw_tile), 128)

    vmem_limit = 48 * 1024 * 1024   # explicit; fits v7x's 64 MiB physical VMEM

    # ---- Pass 1: tiled global-average-pool + (1x1 conv . BN . ReLU) -> (N, C_out)
    red_grid = pl.cdiv(hw, t_red)
    y = pl.pallas_call(
        functools.partial(_pool_conv_bn_relu_kernel, hw=hw, hw_tile=t_red),
        out_shape=jax.ShapeDtypeStruct((n, c_out), jnp.float32),
        grid=(red_grid,),
        in_specs=[
            pl.BlockSpec((n, c_in, t_red), lambda k: (0, 0, k)),
            pl.BlockSpec((c_in, c_out), lambda k: (0, 0)),
            pl.BlockSpec((1, c_out), lambda k: (0, 0)),
        ],
        out_specs=pl.BlockSpec((n, c_out), lambda k: (0, 0)),
        scratch_shapes=[pltpu.VMEM((n, c_in, 128), jnp.float32)],
        compiler_params=pltpu.CompilerParams(
            dimension_semantics=("arbitrary",),
            vmem_limit_bytes=vmem_limit),
        cost_estimate=pl.CostEstimate(
            flops=n * c_in * hw + 2 * n * c_in * c_out,
            transcendentals=0,
            bytes_accessed=n * c_in * hw * in_itemsize + c_in * c_out * 4 + n * c_out * 4),
    )(x_flat, w_folded, shift)

    # ---- Pass 2: broadcast (== bilinear upsample from 1x1, align_corners=True)
    bc_grid = pl.cdiv(hw, t_bc)
    out_flat = pl.pallas_call(
        _broadcast_kernel,
        out_shape=jax.ShapeDtypeStruct((n, c_out, hw), x.dtype),
        grid=(bc_grid,),
        in_specs=[pl.BlockSpec((n, c_out), lambda i: (0, 0))],
        out_specs=pl.BlockSpec((n, c_out, t_bc), lambda i: (0, 0, i)),
        compiler_params=pltpu.CompilerParams(
            dimension_semantics=("parallel",),
            vmem_limit_bytes=vmem_limit),
        cost_estimate=pl.CostEstimate(
            flops=0,
            transcendentals=0,
            bytes_accessed=n * c_out * 4 + n * c_out * hw * out_itemsize),
    )(y)

    return out_flat.reshape(n, c_out, h, w)


def _reference(x, conv_w, bn_gamma, bn_beta, bn_mean, bn_var, eps=1e-5):
    # pure-JAX reference of the same forward pass
    pooled = jnp.mean(x.astype(jnp.float32), axis=(2, 3))                 # (N, C_in)
    y = pooled @ conv_w.reshape(conv_w.shape[0], -1).astype(jnp.float32).T
    inv_std = 1.0 / jnp.sqrt(bn_var.astype(jnp.float32) + eps)
    y = (y - bn_mean) * inv_std * bn_gamma + bn_beta
    y = jnp.maximum(y, 0.0)
    return jnp.broadcast_to(
        y[:, :, None, None],
        (x.shape[0], conv_w.shape[0], x.shape[2], x.shape[3])).astype(x.dtype)


if __name__ == "__main__":
    key = jax.random.PRNGKey(0)
    kx, kw = jax.random.split(key)

    # HW = 240 is deliberately NOT a multiple of 128 so the masked-tail path is
    # exercised; hw_tile=128 forces a multi-step pipelined grid at small shapes.
    N, C_IN, C_OUT, H, W = 2, 4, 8, 16, 15
    x = jax.random.normal(kx, (N, C_IN, H, W), dtype=jnp.float32)

    conv_w = jax.random.normal(kw, (C_OUT, C_IN, 1, 1), dtype=jnp.float32) * 0.1
    # Non-trivial eval-mode BN running stats (tests the scale/shift folding).
    bn_gamma = 0.5 + 0.1 * jnp.arange(C_OUT, dtype=jnp.float32)
    bn_beta = 0.05 * jnp.arange(C_OUT, dtype=jnp.float32) - 0.1
    bn_mean = 0.01 * jnp.arange(C_OUT, dtype=jnp.float32)
    bn_var = 1.0 + 0.1 * jnp.arange(C_OUT, dtype=jnp.float32)

    out = aspp_pooling(x, conv_w, bn_gamma, bn_beta, bn_mean, bn_var, hw_tile=128)
    out = jax.block_until_ready(out)

    ref = _reference(x, conv_w, bn_gamma, bn_beta, bn_mean, bn_var)
    assert out.shape == (N, C_OUT, H, W)
    assert jnp.allclose(out, ref, atol=1e-5, rtol=1e-5), \
        float(jnp.max(jnp.abs(out - ref)))

    print("KERNEL_OK")
</pallas_src>

<mosaic_0001>
module attributes {stable_mosaic.version = 11 : i64} {
  func.func @_pool_conv_bn_relu_kernel(%arg0: i32, %arg1: memref<2x4x128xf32, #tpu.memory_space<vmem>>, %arg2: memref<4x8xf32, #tpu.memory_space<vmem>>, %arg3: memref<1x8xf32, #tpu.memory_space<vmem>>, %arg4: memref<2x8xf32, #tpu.memory_space<vmem>>, %arg5: memref<2x4x128xf32, #tpu.memory_space<vmem>>) attributes {dimension_semantics = [#tpu.dimension_semantics<arbitrary>], iteration_bounds = array<i64: 2>, scalar_prefetch = 0 : i64, scratch_operands = 1 : i64, tpu.core_type = #tpu.core_type<tc>, window_params = [{transform_indices = @transform_0, window_bounds = array<i64: 2, 4, 128>}, {pipeline_mode = #tpu.pipeline_mode<synchronous>, transform_indices = @transform_1, window_bounds = array<i64: 4, 8>}, {pipeline_mode = #tpu.pipeline_mode<synchronous>, transform_indices = @transform_2, window_bounds = array<i64: 1, 8>}, {pipeline_mode = #tpu.pipeline_mode<synchronous>, transform_indices = @transform_3, window_bounds = array<i64: 2, 8>}]} {
    %c0_i32 = arith.constant 0 : i32
    %0 = arith.cmpi eq, %arg0, %c0_i32 : i32
    %1 = arith.extui %0 : i1 to i32
    %c0_i32_0 = arith.constant 0 : i32
    %2 = arith.cmpi ne, %1, %c0_i32_0 : i32
    scf.if %2 {
      %cst_12 = arith.constant 0.000000e+00 : f32
      %23 = vector.broadcast %cst_12 : f32 to vector<2x4x128xf32>
      %c0_13 = arith.constant 0 : index
      %c0_14 = arith.constant 0 : index
      %c0_15 = arith.constant 0 : index
      %24 = vector.load %arg5[%c0_13, %c0_14, %c0_15] : memref<2x4x128xf32, #tpu.memory_space<vmem>>, vector<2x4x128xf32>
      tpu.vector_store %arg5[%c0_13, %c0_14, %c0_15], %23 {strides = array<i32>} : memref<2x4x128xf32, #tpu.memory_space<vmem>>, vector<2x4x128xf32>,
    } else {
    }
    %c128_i32 = arith.constant 128 : i32
    %3 = arith.muli %arg0, %c128_i32 : i32
    %cst = arith.constant 0.000000e+00 : f32
    %4 = vector.broadcast %cst : f32 to vector<2x4x128xf32>
    %5 = tpu.iota {dimensions = array<i32: 2>} : vector<1x1x128xi32>
    %c0_i32_1 = arith.constant 0 : i32
    %6 = arith.addi %3, %c0_i32_1 : i32
    %7 = vector.broadcast %6 : i32 to vector<1x1x128xi32>
    %8 = arith.addi %5, %7 : vector<1x1x128xi32>
    %c0 = arith.constant 0 : index
    %c0_2 = arith.constant 0 : index
    %c0_3 = arith.constant 0 : index
    %9 = vector.load %arg1[%c0, %c0_2, %c0_3] : memref<2x4x128xf32, #tpu.memory_space<vmem>>, vector<2x4x128xf32>
    %c240_i32 = arith.constant 240 : i32
    %10 = vector.broadcast %c240_i32 : i32 to vector<1x1x128xi32>
    %11 = arith.cmpi slt, %8, %10 : vector<1x1x128xi32>
    %cst_4 = arith.constant 0.000000e+00 : f32
    %12 = vector.shape_cast %11 : vector<1x1x128xi1> to vector<1x1x128xi1>
    %13 = vector.broadcast %12 : vector<1x1x128xi1> to vector<2x4x128xi1>
    %14 = vector.broadcast %cst_4 : f32 to vector<2x4x128xf32>
    %15 = arith.select %13, %9, %14 : vector<2x4x128xi1>, vector<2x4x128xf32>
    %16 = arith.addf %4, %15 : vector<2x4x128xf32>
    %c0_5 = arith.constant 0 : index
    %c0_6 = arith.constant 0 : index
    %c0_7 = arith.constant 0 : index
    %17 = vector.load %arg5[%c0_5, %c0_6, %c0_7] : memref<2x4x128xf32, #tpu.memory_space<vmem>>, vector<2x4x128xf32>
    %18 = arith.addf %17, %16 : vector<2x4x128xf32>
    %c0_8 = arith.constant 0 : index
    %c0_9 = arith.constant 0 : index
    %c0_10 = arith.constant 0 : index
    %19 = vector.load %arg5[%c0_8, %c0_9, %c0_10] : memref<2x4x128xf32, #tpu.memory_space<vmem>>, vector<2x4x128xf32>
    tpu.vector_store %arg5[%c0_8, %c0_9, %c0_10], %18 {strides = array<i32>} : memref<2x4x128xf32, #tpu.memory_space<vmem>>, vector<2x4x128xf32>,
    %c1_i32 = arith.constant 1 : i32
    %20 = arith.cmpi eq, %arg0, %c1_i32 : i32
    %21 = arith.extui %20 : i1 to i32
    %c0_i32_11 = arith.constant 0 : i32
    %22 = arith.cmpi ne, %21, %c0_i32_11 : i32
    scf.if %22 {
      %c0_12 = arith.constant 0 : index
      %c0_13 = arith.constant 0 : index
      %c0_14 = arith.constant 0 : index
      %23 = vector.load %arg5[%c0_12, %c0_13, %c0_14] : memref<2x4x128xf32, #tpu.memory_space<vmem>>, vector<2x4x128xf32>
      %cst_15 = arith.constant dense<0.000000e+00> : vector<2x4xf32>
      %24 = vector.multi_reduction <add>, %23, %cst_15 [2] : vector<2x4x128xf32> to vector<2x4xf32>
      %cst_16 = arith.constant 0.00416666688 : f32
      %25 = vector.broadcast %cst_16 : f32 to vector<2x4xf32>
      %26 = arith.mulf %24, %25 : vector<2x4xf32>
      %c0_17 = arith.constant 0 : index
      %c0_18 = arith.constant 0 : index
      %27 = vector.load %arg2[%c0_17, %c0_18] : memref<4x8xf32, #tpu.memory_space<vmem>>, vector<4x8xf32>
      %cst_19 = arith.constant dense<0.000000e+00> : vector<2x8xf32>
      %28 = tpu.matmul %26, %27, %cst_19 {dimension_numbers = #tpu.dot_dimension_numbers<[1], [0], [0], [1], [0, 0, 1, 1], [], []>} : vector<2x4xf32>, vector<4x8xf32>, vector<2x8xf32> -> vector<2x8xf32>
      %c0_20 = arith.constant 0 : index
      %c0_21 = arith.constant 0 : index
      %29 = vector.load %arg3[%c0_20, %c0_21] : memref<1x8xf32, #tpu.memory_space<vmem>>, vector<1x8xf32>
      %30 = vector.broadcast %29 : vector<1x8xf32> to vector<2x8xf32>
      %31 = arith.addf %28, %30 : vector<2x8xf32>
      %cst_22 = arith.constant 0.000000e+00 : f32
      %32 = vector.broadcast %cst_22 : f32 to vector<2x8xf32>
      %33 = arith.maximumf %31, %32 : vector<2x8xf32>
      %c0_23 = arith.constant 0 : index
      %c0_24 = arith.constant 0 : index
      %34 = vector.load %arg4[%c0_23, %c0_24] : memref<2x8xf32, #tpu.memory_space<vmem>>, vector<2x8xf32>
      tpu.vector_store %arg4[%c0_23, %c0_24], %33 {strides = array<i32>} : memref<2x8xf32, #tpu.memory_space<vmem>>, vector<2x8xf32>,
    } else {
    }
    return
  }
  func.func @transform_0(%arg0: i32) -> (i32, i32, i32) {
    %c0_i32 = arith.constant 0 : i32
    %c0_i32_0 = arith.constant 0 : i32
    %c0_i32_1 = arith.constant 0 : i32
    return %c0_i32, %c0_i32_0, %arg0 : i32, i32, i32
  }
  func.func @transform_1(%arg0: i32) -> (i32, i32) {
    %c0_i32 = arith.constant 0 : i32
    %c0_i32_0 = arith.constant 0 : i32
    %c0_i32_1 = arith.constant 0 : i32
    return %c0_i32, %c0_i32_0 : i32, i32
  }
  func.func @transform_2(%arg0: i32) -> (i32, i32) {
    %c0_i32 = arith.constant 0 : i32
    %c0_i32_0 = arith.constant 0 : i32
    %c0_i32_1 = arith.constant 0 : i32
    return %c0_i32, %c0_i32_0 : i32, i32
  }
  func.func @transform_3(%arg0: i32) -> (i32, i32) {
    %c0_i32 = arith.constant 0 : i32
    %c0_i32_0 = arith.constant 0 : i32
    %c0_i32_1 = arith.constant 0 : i32
    return %c0_i32, %c0_i32_0 : i32, i32
  }
}

</mosaic_0001>

<bundles_post_ra>
// kernel: tpu_custom_call.1
= control target key start
LH: loop header
LB: loop body
LE: loop exit
PB: predicated region body
PF: predicated region fallthrough
CT: control target
= control target key end

     0   :  { %8 = vsyncpa [#allocation4], 0  ;;  %s816_s0 = inlined_call_operand.hbm [shape: f32[2,4,240], index: 0, kind: input, shape index: {}]   ;;  %s817_s1 = inlined_call_operand.hbm [shape: f32[4,8], index: 1, kind: input, shape index: {}]   ;;  %s818_s2 = inlined_call_operand.vmem [shape: f32[1,8], index: 2, kind: input, shape index: {}]   ;;  %s819_s3 = inlined_call_operand.hbm [shape: f32[2,8], index: 3, kind: output, shape index: {}]  }
   0x1   :  { %10 = vsyncpa [#allocation4 + $0x1], 0 }
   0x2   :  { %11 = vsyncpa [#allocation7], 0 }
   0x3   :  { %12 = vsyncpa [#allocation5], 0  ;;  %s642_s12 = smov 0   ;;  %s644_s13 = smov 0  }
   0x4   :  { %s646_s14 = smov 0   ;;  %s648_s15 = smov 0  }
   0x5 LB: > { %s661_s16 = sadd.s32 4294967295, %s611_s15   ;;  %s664_s17 = sadd.s32 1, %s611_s15   ;;  %s611_s15 = sphi %s648_s15, %s838_s15   ;;  %s607_s14 = sphi %s646_s14, %s837_s14   ;;  %s603_s13 = sphi %s644_s13, %s836_s13   ;;  %s599_s12 = sphi %s642_s12, %s835_s12  }
   0x6   : > { %s22_s18 = ssub.s32 %s611_s15, %s664_s17  ;;  %s25_s19 = sadd.s32 1, %s607_s14 }
   0x7   : > { %p23_p0 = scmp.eq.s32.totalorder %s22_s18, 0  ;;  %p32_p1 = scmp.ne.s32.totalorder %s607_s14, %s603_s13 }
   0x8   : > { %p33_p2 = scmp.eq.s32.totalorder %s611_s15, 0  ;;  %p38_p3 = scmp.ne.s32.totalorder %s603_s13, %s599_s12 }
   0x9   : > { %s674_s20 = scalar_select %p23_p0, %s607_s14, %s25_s19  }
   0xa   : > { %p676_p4 = por %p33_p2, %p32_p1  ;;  %p820_p5 = scmp.eq.s32.totalorder %s661_s16, 0 }
   0xb   : > { %p397_p6 = scmp.ge.s32.totalorder %s611_s15, 1  ;;  %p112_p7 = scmp.lt.s32.totalorder %s611_s15, 3 }
   0xc   : > { %p685_p8 = por %p820_p5, %p38_p3  ;;  %s613_s24 = smov [#allocation6]  }
   0xd   : > { %p690_p10 = pnand %p397_p6, %p112_p7  ;;  %s125_s25 = sshll.u32 %s613_s24, 4  ;;  %s126_s25 = int_to_ptr.vmem [resolvable:$true] %s125_s25 }
   0xe   : > { %s825_s22 = scalar_select %p685_p8, 1, 0 }
   0xf   : > { %s826_s23 = scalar_select %p690_p10, 1, 0 }
  0x10   : > { %p432_p11 = pneg %p690_p10  ;;  %p441_p12 = scmp.lt.s32.totalorder %s611_s15, 2 }
  0x11   : > { %s139_s26 = sand.u32 1, %s607_s14   ;;  %s485_s5 = scalar_lea.hbm %s817_s1, 64 }
  0x12   : > { %p700_p13 = pnand %p432_p11, %p820_p5  ;;  %p706_p0 = pnand %p441_p12, %p676_p4 }
  0x13   : > { %s400_s29 = sshll.u32 %s139_s26, 3  ;;  %p486_p1 = scmp.ne.s32.totalorder %s817_s1, %s485_s5 }
  0x14   : > { %s828_s28 = scalar_select %p706_p0, 1, 0 }
  0x15   : > { %p487_p2 = pneg %p700_p13  ;;  %p492_p4 = scmp.lt.u32.totalorder %s485_s5, %s817_s1 }
  0x17   : > { %p488_p3 = pnand %p487_p2, %p486_p1 }
  0x19   : > { %p489_p6 = pneg %p488_p3 }
  0x1b   : > { %p494_p7 = pnand %p492_p4, %p489_p6 }
  0x1d   : > { %497 = shalt.err (!%p494_p7)
}
  0x1e   : > { %s498_s10 = scalar_lea.vmem %s126_s25, 64  ;;  %p506_p5 = scmp.lt.s32.totalorder %s126_s25, %s126_s25 }
  0x1f   : > { %p499_p11 = scmp.ne.s32.totalorder %s126_s25, %s498_s10  ;;  %p507_p8 = scmp.lt.s32.totalorder %s498_s10, %s498_s10 }
  0x21   : > { %p501_p12 = pnand %p499_p11, %p487_p2  ;;  %p508_p10 = por %p507_p8, %p506_p5 }
  0x23   : > { %p502_p9 = pneg %p501_p12 }
  0x25   : > { %p509_p0 = pnand %p508_p10, %p502_p9 }
  0x27   : > { %512 = shalt.err (!%p509_p0)
}
  0x28   : > { %435 = dma.hbm_to_vmem [thread:$0]  (!%p700_p13), %s817_s1, 64, %s126_s25, [#allocation7]  }
  0x29   : > { %s401_s18 = sshll.u32 %s611_s15, 6  ;;  %s143_s30 = scalar_lea.vmem [#allocation3], %s400_s29 }
  0x2a   : > { %s730_s24 = scalar_lea.hbm %s816_s0, %s401_s18  ;;  %s149_s4 = sshll.u32 %s143_s30, 4  ;;  %s732_s4 = int_to_ptr.vmem [resolvable:$true] %s149_s4 }
  0x2b   : > { %s734_s27 = scalar_lea.sflag [#allocation4], %s139_s26  ;;  %s513_s5 = scalar_lea.hbm %s730_s24, 128 }
  0x2c   : > { %p514_p5 = scmp.ne.s32.totalorder %s730_s24, %s513_s5  ;;  %p829_p8 = scmp.ne.s32.totalorder %s828_s28, 0 }
  0x2d   : > { %s518_s6 = scalar_lea.hbm %s816_s0, 256  ;;  %p519_p0 = scmp.lt.u32.totalorder %s730_s24, %s816_s0 }
  0x2e   : > { %p515_p9 = pneg %p829_p8  ;;  %p520_p1 = scmp.lt.u32.totalorder %s518_s6, %s513_s5 }
  0x2f   : > { %p522_p3 = scmp.lt.u32.totalorder %s513_s5, %s730_s24 }
  0x30   : > { %p516_p10 = pnand %p515_p9, %p514_p5  ;;  %p521_p2 = por %p520_p1, %p519_p0 }
  0x32   : > { %p517_p13 = pneg %p516_p10  ;;  %p523_p6 = por %p522_p3, %p521_p2 }
  0x34   : > { %p524_p4 = pnand %p523_p6, %p517_p13 }
  0x36   : > { %527 = shalt.err (!%p524_p4)
}
  0x37   : > { %s528_s26 = scalar_lea.vmem %s732_s4, 128  ;;  %s614_s29 = smov [#allocation3]  }
  0x38   : > { %p529_p7 = scmp.ne.s32.totalorder %s732_s4, %s528_s26  ;;  %s533_s9 = sshll.u32 %s614_s29, 4  ;;  %s534_s9 = int_to_ptr.vmem [resolvable:$false] %s533_s9 }
  0x39   : > { %s535_s10 = scalar_lea.vmem %s534_s9, 256  ;;  %p536_p5 = scmp.lt.s32.totalorder %s732_s4, %s534_s9 }
  0x3a   : > { %p531_p11 = pnand %p529_p7, %p515_p9  ;;  %p537_p10 = scmp.lt.s32.totalorder %s535_s10, %s528_s26 }
  0x3c   : > { %p532_p12 = pneg %p531_p11  ;;  %p538_p0 = por %p537_p10, %p536_p5 }
  0x3e   : > { %p539_p1 = pnand %p538_p0, %p532_p12 }
  0x40   : > { %542 = shalt.err (!%p539_p1)
}
  0x41   : > { %s615_s11 = smov 128   ;;  %s616_s12 = smov 64  }
  0x42   : > { %s617_s18 = smov 4   ;;  %p830_p9 = scmp.ne.s32.totalorder %s826_s23, 0 }
  0x43   : > { %439 = dma.hbm_to_vmem [thread:$0]  (!%p829_p8), %s730_s24, 128, %s732_s4, %s734_s27, %s615_s11, %s616_s12, %s617_s18  }
  0x44   : > { %161 = sbr.rel (%p830_p9) target bundleno = 500 (0x1f4), region = 32  ;;  %s163_s19 = sand.u32 (!%p830_p9), 1, %s603_s13  }
  0x45   : > { %s403_s21 = sshll.u32 (!%p830_p9), %s163_s19, 3  ;;  %s164_s30 = scalar_lea.sflag (!%p830_p9), [#allocation4], %s163_s19 }
  0x46   : > { %s167_s5 = scalar_lea.vmem (!%p830_p9), [#allocation3], %s403_s21  ;;  %p831_p13 = scmp.ne.s32.totalorder (!%p830_p9), %s825_s22, 0 }
  0x4b   : > { %586 = dma.done.wait (%p831_p13), %s164_s30, 128  }
  0x4c   : > { %588 = vsyncadd (%p831_p13), %s164_s30, 4294967168  ;;  %p832_p2 = scmp.eq.s32.totalorder %s661_s16, 0 }
  0x4e   : > { %590 = dma.done.wait (%p832_p2), [#allocation7], 64   ;;  %p833_p3 = pmov %p832_p2 }
  0x4f   : > { %p834_p8 = scmp.ne.s32.totalorder %s661_s16, 0 }
  0x50   : > { %592 = vsyncadd (%p833_p3), [#allocation7], 4294967232  ;;  %v618_v0 = vmov (!%p834_p8), 0.0  }
  0x51   : > { %192 = sbr.rel (%p834_p8) target bundleno = 88 (0x58), region = 44  ;;  %193 = vst [vmem:[#allocation2] sm:$0xf] (!%p834_p8), %v618_v0  ;;  %194 = vst [vmem:[#allocation2 + $0x4] sm:$0xf] (!%p834_p8), %v618_v0 }
  0x58 PF: > { %s406_s23 = sshll.u32 %s661_s16, 7  ;;  %v196_v1 = vlaneseq  ;;  %v200_v5 = vld [vmem:[%s167_s5] sm:$0xf]  ;;  %v201_v6 = vld [vmem:[%s167_s5 + $0x4] sm:$0xf]  ;;  %p407_p6 = scmp.ne.s32.totalorder %s661_s16, 1 }
  0x59   : > { %v198_v2 = vstv %s406_s23  ;;  %v209_v7 = vld [vmem:[#allocation2] sm:$0xf]  ;;  %v210_v8 = vld [vmem:[#allocation2 + $0x4] sm:$0xf]  ;;  %vm221_vm1 = vcmask (!%p407_p6), 1043456   ;;  %v619_v18 = vmov (!%p407_p6), 0.0  }
  0x5a   : > { %v197_v3 = vand.u32 127, %v196_v1  ;;  %v230_v17 = vld [vmem:[#allocation6] sm:$0xf] (!%p407_p6)  ;;  %417 = vmatprep.subr.mxu0 (!%p407_p6), %v619_v18  ;;  %vm620_vm2 = vmmov (!%p407_p6), 0   ;;  %v241_v19 = vshrl.u32 (!%p407_p6), %v196_v1, 7  ;;  %vm248_vm3 = vcmask (!%p407_p6), 1041409  }
  0x5b   : > { %419 = vmatprep.mubr.msk.f32.mxu0 (!%p407_p6), %vm620_vm2, %v619_v18  ;;  %418 = vmatpush3.msk.msra.mxu0 (!%p407_p6), %vm221_vm1, %v230_v17  ;;  %vm250_vm4 = vcmask (!%p407_p6), 31744   ;;  %v408_v28 = vld [vmem:[%s818_s2] ss:$0 sm:$0xff] (!%p407_p6)  ;;  %vm327_vm5 = vcmask (!%p407_p6), 58368  }
  0x5c   : > { %v199_v4 = vadd.s32 %v198_v2, %v197_v3  ;;  %218 = sbr.rel (%p407_p6) target bundleno = 475 (0x1db), region = 48  ;;  %v242_v21 = vsub.s32 (!%p407_p6), %v197_v3, %v241_v19 }
  0x5e   : > { %vm202_vm0 = vcmp.lt.s32.totalorder %v199_v4, 240 }
  0x5f   : > { %v205_v9 = vsel %vm202_vm0, %v200_v5, 0.0  ;;  %v206_v10 = vsel %vm202_vm0, %v201_v6, 0.0 }
  0x60   : > { %v211_v11 = vadd.f32 %v209_v7, %v205_v9  ;;  %v212_v12 = vadd.f32 %v210_v8, %v206_v10 }
  0x62   : > { %213 = vst [vmem:[#allocation2] sm:$0xf] %v211_v11  ;;  %214 = vst [vmem:[#allocation2 + $0x4] sm:$0xf] %v212_v12 }
  0x69   : > { %v219_v13 = vld [vmem:[#allocation2] sm:$0xf]  ;;  %v220_v14 = vld [vmem:[#allocation2 + $0x4] sm:$0xf] }
  0x6a   : > { %v222_v15 = vsel %vm221_vm1, %v219_v13, 0.0  ;;  %v225_v16 = vsel %vm221_vm1, %v220_v14, 0.0 }
  0x6b   : > { %223 = vadd.xlane.f32.xlu0 %v222_v15 }
  0x6f   : > { %226 = vadd.xlane.f32.xlu0 %v225_v16 }
  0xf8   : > { %v224_v20 = vpop.xlane.xlu0 %223 }
  0xf9   : > { %v228_v22 = vmul.f32 0.004166667, %v224_v20 }
  0xfb   : > { %v243_v25 = vrot.slane %v228_v22, %v242_v21 }
  0xfc   : > { %v227_v23 = vpop.xlane.xlu0 %226 }
  0xfd   : > { %v229_v24 = vmul.f32 0.004166667, %v227_v23 }
  0xff   : > { %v247_v26 = vrot.slane %v229_v24, %v242_v21 }
 0x101   : > { %v249_v27 = vsel %vm248_vm3, %v247_v26, %v243_v25 }
 0x102   : > { %420 = vmatmul.mubr.msk.f32.vlgmr.msra.gmra.mrb[0].mxu0 %vm250_vm4, %v249_v27 }
 0x1d5   : > { %v322_v29 = vpop.f32.mrb[0].mxu0 }
 0x1d6   : > { %v323_v30 = vadd.f32 %v408_v28, %v322_v29  ;;  %v421_v31 = vpop.f32.mrb[1].mxu0 }
 0x1d8   : > { %v326_v32 = vmax.f32 %v323_v30, 0.0 }
 0x1da   : > { %328 = vst.msk [vmem:[#allocation8] sm:$0x3] %vm327_vm5, %v326_v32 }
 0x1db PF: > { %p443_p4 = scmp.eq.s32.totalorder %s661_s16, 1  ;;  %s621_s24 = smov [#allocation8]  }
 0x1dc   : > { %s336_s4 = sshll.u32 %s621_s24, 4  ;;  %s337_s4 = int_to_ptr.vmem [resolvable:$true] %s336_s4 }
 0x1dd   : > { %s543_s27 = scalar_lea.vmem %s337_s4, 32  ;;  %p550_p5 = scmp.lt.s32.totalorder %s337_s4, %s337_s4 }
 0x1de   : > { %p544_p7 = scmp.ne.s32.totalorder %s337_s4, %s543_s27  ;;  %p551_p10 = scmp.lt.s32.totalorder %s543_s27, %s543_s27 }
 0x1e0   : > { %p545_p11 = pnand %p544_p7, %p443_p4  ;;  %p552_p0 = por %p551_p10, %p550_p5 }
 0x1e2   : > { %p546_p12 = pneg %p545_p11 }
 0x1e4   : > { %p553_p1 = pnand %p552_p0, %p546_p12 }
 0x1e6   : > { %556 = shalt.err (!%p553_p1)
}
 0x1e7   : > { %s557_s6 = scalar_lea.hbm %s819_s3, 32 }
 0x1e8   : > { %p558_p9 = scmp.ne.s32.totalorder %s819_s3, %s557_s6  ;;  %p563_p3 = scmp.lt.u32.totalorder %s557_s6, %s819_s3 }
 0x1ea   : > { %p559_p13 = pnand %p558_p9, %p443_p4 }
 0x1ec   : > { %p560_p2 = pneg %p559_p13 }
 0x1ee   : > { %p565_p8 = pnand %p563_p3, %p560_p2 }
 0x1f0   : > { %568 = shalt.err (!%p565_p8)
}
 0x1f1   : > { %429 = dma.vmem_to_hbm [thread:$0]  (%p443_p4), %s337_s4, 32, %s819_s3, [#allocation5]  }
 0x1f2   : > { %594 = dma.done.wait (%p443_p4), [#allocation5], 32  }
 0x1f3   : > { %596 = vsyncadd (%p443_p4), [#allocation5], 4294967264 }
 0x1f4 PF: > { %p15_p6 = scmp.ge.s32.totalorder %s664_s17, 4   ;;  %s835_s12 = smov %s603_s13 }
 0x1f5   : > { %s836_s13 = smov %s607_s14  ;;  %s837_s14 = smov %s674_s20 }
 0x1f6   : > { %s838_s15 = smov %s664_s17  ;;  %17 = sbr.rel (!%p15_p6) target bundleno = 5 (0x5), region = 81 }
 0x1fd   :  { %349 = vsyncpa [#allocation4], 1 }
 0x1fe   :  { %351 = vsyncpa [#allocation4 + $0x1], 1 }
 0x1ff   :  { %352 = vsyncpa [#allocation7], 1 }
 0x200   :  { %353 = vsyncpa [#allocation5], 1 }
 0x201   :  { %355 = vsyncpa [#allocation5 + $0x1], 1 }

</bundles_post_ra>
